<compile_context>
chip_gen: v7x
topology: tpu7x:2x2x1
jax: 0.10.0
libtpu: 0.0.40
codegen_flags: <defaults>
</compile_context>

<pallas_src>
import functools
import math

import jax
import jax.numpy as jnp
from jax.experimental import pallas as pl
from jax.experimental.pallas import tpu as pltpu


def _round_up(x: int, m: int) -> int:
    return (x + m - 1) // m * m


def _mlp_kernel(x_ref, w1_ref, b1_ref, w2_ref, b2_ref, w3_ref, b3_ref, o_ref,
                *, approx_sigmoid: bool):
    mxu_dtype = w1_ref.dtype            # bf16 (fast path) or f32 (exact path)

    # x arrives already in the MXU dtype (cast once in the wrapper).
    x = x_ref[...]

    # hidden1 -> ReLU; cast to the MXU dtype immediately so the f32 copy's
    # live range ends here (dropout p=0.0 is the identity).
    h1 = jnp.maximum(
        jnp.dot(x, w1_ref[...], preferred_element_type=jnp.float32) + b1_ref[...],
        0.0,
    ).astype(mxu_dtype)

    # hidden2 -> ReLU (kept f32: consumed only by the VPU below).
    h2 = jnp.maximum(
        jnp.dot(h1, w2_ref[...], preferred_element_type=jnp.float32) + b2_ref[...],
        0.0,
    )

    # output layer (N -> 1): VPU multiply + cross-lane reduction; b3 scalar
    # lives in SMEM.
    logit = jnp.sum(h2 * w3_ref[...], axis=-1) + b3_ref[0, 0]          # (tb,)

    # sigmoid: exp on the EUP; reciprocal approx (EUP) on the fast path, exact
    # divide on the f32 path (keeps outputs strictly inside (0, 1)).
    sig = pl.reciprocal(1.0 + jnp.exp(-logit), approx=approx_sigmoid)

    # lane-dense store: the whole batch tile goes out as one (1, 1, tb) row.
    o_ref[...] = sig.reshape(o_ref.shape).astype(o_ref.dtype)


def neural_network_stat(x, w1, b1, w2, b2, w3, b3, *,
                        mxu_dtype=jnp.bfloat16, block_b: int = 512,
                        approx_sigmoid=None):
    """
    x:  (B, N) float32
    w1: (N, N)  b1: (1, N)      -- hidden1 (pre-transposed, (in, out))
    w2: (N, N)  b2: (1, N)      -- hidden2 (pre-transposed, (in, out))
    w3: (N, 1)  b3: (1, 1)      -- output layer
    returns (B, 1) float32 in (0, 1)
    """
    B, N = x.shape
    mxu_dtype = jnp.dtype(mxu_dtype)
    if approx_sigmoid is None:
        approx_sigmoid = mxu_dtype != jnp.dtype(jnp.float32)

    # Batch-tile granularity = native sublane packing of the streamed dtype
    # (8 rows for 4-byte, 16 for 2-byte) so x blocks stay layout-aligned.
    g = 32 // mxu_dtype.itemsize

    bg = _round_up(B, g)
    tb_max = max(g, min(_round_up(block_b, g), bg))
    # Prefer a tile that divides the (g-rounded) batch so we never rewrite the
    # whole input through HBM just to pad it (at most g-1 pad rows otherwise).
    tb = g
    for cand in range(tb_max, g - 1, -g):
        if bg % cand == 0:
            tb = cand
            break
    if tb < tb_max // 2:          # no reasonable divisor: accept padding to tb_max
        tb = tb_max
    b_padded = _round_up(B, tb)
    num_tiles = b_padded // tb

    # Cast the streamed operand once, in the wrapper (halves its HBM traffic
    # and the double-buffered x-tile VMEM footprint when bf16).
    x_in = x.astype(mxu_dtype)
    if b_padded != B:
        x_in = jnp.pad(x_in, ((0, b_padded - B), (0, 0)))

    w1c = w1.astype(mxu_dtype)
    w2c = w2.astype(mxu_dtype)
    b1r = jnp.asarray(b1, jnp.float32).reshape(1, N)
    b2r = jnp.asarray(b2, jnp.float32).reshape(1, N)
    w3r = jnp.asarray(w3, jnp.float32).reshape(1, N)   # used on the VPU
    b3s = jnp.asarray(b3, jnp.float32).reshape(1, 1)   # scalar -> SMEM

    # Explicit VMEM budget (default scoped limits are 16/32 MiB, far below
    # physical): double-buffered x tiles + single-buffered weights/biases
    # + f32 h1/h2 intermediates + output rows, with ~25% headroom.
    elt = mxu_dtype.itemsize
    vmem_need = (2 * tb * N * elt            # x (2 pipeline buffers)
                 + 2 * N * N * elt           # w1, w2 (Buffered(1))
                 + 3 * N * 4                 # b1, b2, w3 rows (f32)
                 + 2 * tb * N * 4            # h1 / h2 f32 intermediates
                 + 2 * tb * 4)               # lane-dense output rows
    vmem_limit = int(min(max(vmem_need * 5 // 4, 16 << 20) + (2 << 20), 100 << 20))

    def resident(shape):
        # Constant index_map + single buffer: fetched once, never re-DMA'd.
        return pl.BlockSpec(shape, lambda i: (0,) * len(shape),
                            pipeline_mode=pl.Buffered(1))

    kernel = functools.partial(_mlp_kernel, approx_sigmoid=approx_sigmoid)

    out = pl.pallas_call(
        kernel,
        out_shape=jax.ShapeDtypeStruct((num_tiles, 1, tb), jnp.float32),
        grid=(num_tiles,),
        in_specs=[
            pl.BlockSpec((tb, N), lambda i: (i, 0)),             # x tile (streamed)
            resident((N, N)),                                    # w1 (VMEM-resident)
            resident((1, N)),                                    # b1
            resident((N, N)),                                    # w2 (VMEM-resident)
            resident((1, N)),                                    # b2
            resident((1, N)),                                    # w3 row
            pl.BlockSpec(memory_space=pltpu.MemorySpace.SMEM),   # b3 scalar
        ],
        out_specs=pl.BlockSpec((1, 1, tb), lambda i: (i, 0, 0)), # lane-dense rows
        compiler_params=pltpu.CompilerParams(
            dimension_semantics=("parallel",),
            vmem_limit_bytes=vmem_limit,
        ),
    )(x_in, w1c, b1r, w2c, b2r, w3r, b3s)

    # (num_tiles, 1, tb) lane-dense slab -> (B, 1); padded rows are dropped here.
    return out.reshape(-1)[:B].reshape(B, 1)


def init_params(key, N):
    """Deterministic init mimicking nn.Linear default (uniform +-1/sqrt(fan_in))."""
    ks = jax.random.split(key, 6)
    bound = 1.0 / math.sqrt(N)
    # Stored already transposed to (in, out).
    w1 = jax.random.uniform(ks[0], (N, N), jnp.float32, -bound, bound)
    b1 = jax.random.uniform(ks[1], (1, N), jnp.float32, -bound, bound)
    w2 = jax.random.uniform(ks[2], (N, N), jnp.float32, -bound, bound)
    b2 = jax.random.uniform(ks[3], (1, N), jnp.float32, -bound, bound)
    w3 = jax.random.uniform(ks[4], (N, 1), jnp.float32, -bound, bound)
    b3 = jax.random.uniform(ks[5], (1, 1), jnp.float32, -bound, bound)
    return w1, b1, w2, b2, w3, b3


def _reference(x, w1, b1, w2, b2, w3, b3):
    h1 = jnp.maximum(x @ w1 + b1, 0.0)
    h2 = jnp.maximum(h1 @ w2 + b2, 0.0)
    return jax.nn.sigmoid(h2 @ w3 + b3)


if __name__ == "__main__":
    key = jax.random.PRNGKey(0)
    k_x, k_p, k_x2 = jax.random.split(key, 3)

    N = 32
    params = init_params(k_p, N)

    # 1) exact-ish path: f32 MXU inputs, exact reciprocal in the sigmoid.
    B = 8
    x = jax.random.normal(k_x, (B, N), jnp.float32)
    ref = _reference(x, *params)
    out_f32 = jax.block_until_ready(
        neural_network_stat(x, *params, mxu_dtype=jnp.float32))
    assert out_f32.shape == (B, 1)
    assert jnp.allclose(out_f32, ref, atol=5e-3, rtol=5e-3), "f32 path mismatch"

    # 2) fast path: bf16-streamed x / bf16 weights, f32 accumulation, EUP recip.
    out_bf16 = jax.block_until_ready(neural_network_stat(x, *params))
    assert out_bf16.shape == (B, 1)
    assert jnp.allclose(out_bf16, ref, atol=3e-2, rtol=3e-2), "bf16 path mismatch"

    # 3) multi-tile + ragged batch: exercises the grid, the lane-dense output
    #    slab and the pad/slice path.
    B2 = 22
    x2 = jax.random.normal(k_x2, (B2, N), jnp.float32)
    ref2 = _reference(x2, *params)
    out2 = jax.block_until_ready(neural_network_stat(x2, *params, block_b=8))
    assert out2.shape == (B2, 1)
    assert jnp.allclose(out2, ref2, atol=3e-2, rtol=3e-2), "tiled path mismatch"

    print("KERNEL_OK")
</pallas_src>

<mosaic_0001>
module attributes {stable_mosaic.version = 11 : i64} {
  func.func @_mlp_kernel(%arg0: i32, %arg1: memref<8x32xf32, #tpu.memory_space<vmem>>, %arg2: memref<32x32xf32, #tpu.memory_space<vmem>>, %arg3: memref<1x32xf32, #tpu.memory_space<vmem>>, %arg4: memref<32x32xf32, #tpu.memory_space<vmem>>, %arg5: memref<1x32xf32, #tpu.memory_space<vmem>>, %arg6: memref<1x32xf32, #tpu.memory_space<vmem>>, %arg7: memref<1x1xf32, #tpu.memory_space<smem>>, %arg8: memref<1x1x8xf32, #tpu.memory_space<vmem>>) attributes {dimension_semantics = [#tpu.dimension_semantics<parallel>], iteration_bounds = array<i64: 1>, scalar_prefetch = 0 : i64, scratch_operands = 0 : i64, tpu.core_type = #tpu.core_type<tc>, window_params = [{transform_indices = @transform_0, window_bounds = array<i64: 8, 32>}, {pipeline_mode = #tpu.pipeline_mode<synchronous>, transform_indices = @transform_1, window_bounds = array<i64: 32, 32>}, {pipeline_mode = #tpu.pipeline_mode<synchronous>, transform_indices = @transform_2, window_bounds = array<i64: 1, 32>}, {pipeline_mode = #tpu.pipeline_mode<synchronous>, transform_indices = @transform_3, window_bounds = array<i64: 32, 32>}, {pipeline_mode = #tpu.pipeline_mode<synchronous>, transform_indices = @transform_4, window_bounds = array<i64: 1, 32>}, {pipeline_mode = #tpu.pipeline_mode<synchronous>, transform_indices = @transform_5, window_bounds = array<i64: 1, 32>}, {transform_indices = @transform_6, window_bounds = array<i64: 1, 1>}, {transform_indices = @transform_7, window_bounds = array<i64: 1, 1, 8>}]} {
    %c0 = arith.constant 0 : index
    %c0_0 = arith.constant 0 : index
    %0 = vector.load %arg1[%c0, %c0_0] : memref<8x32xf32, #tpu.memory_space<vmem>>, vector<8x32xf32>
    %c0_1 = arith.constant 0 : index
    %c0_2 = arith.constant 0 : index
    %1 = vector.load %arg2[%c0_1, %c0_2] : memref<32x32xf32, #tpu.memory_space<vmem>>, vector<32x32xf32>
    %cst = arith.constant dense<0.000000e+00> : vector<8x32xf32>
    %2 = tpu.matmul %0, %1, %cst {dimension_numbers = #tpu.dot_dimension_numbers<[1], [0], [0], [1], [0, 0, 1, 1], [], []>} : vector<8x32xf32>, vector<32x32xf32>, vector<8x32xf32> -> vector<8x32xf32>
    %c0_3 = arith.constant 0 : index
    %c0_4 = arith.constant 0 : index
    %3 = vector.load %arg3[%c0_3, %c0_4] : memref<1x32xf32, #tpu.memory_space<vmem>>, vector<1x32xf32>
    %4 = vector.broadcast %3 : vector<1x32xf32> to vector<8x32xf32>
    %5 = arith.addf %2, %4 : vector<8x32xf32>
    %cst_5 = arith.constant 0.000000e+00 : f32
    %6 = vector.broadcast %cst_5 : f32 to vector<8x32xf32>
    %7 = arith.maximumf %5, %6 : vector<8x32xf32>
    %c0_6 = arith.constant 0 : index
    %c0_7 = arith.constant 0 : index
    %8 = vector.load %arg4[%c0_6, %c0_7] : memref<32x32xf32, #tpu.memory_space<vmem>>, vector<32x32xf32>
    %cst_8 = arith.constant dense<0.000000e+00> : vector<8x32xf32>
    %9 = tpu.matmul %7, %8, %cst_8 {dimension_numbers = #tpu.dot_dimension_numbers<[1], [0], [0], [1], [0, 0, 1, 1], [], []>} : vector<8x32xf32>, vector<32x32xf32>, vector<8x32xf32> -> vector<8x32xf32>
    %c0_9 = arith.constant 0 : index
    %c0_10 = arith.constant 0 : index
    %10 = vector.load %arg5[%c0_9, %c0_10] : memref<1x32xf32, #tpu.memory_space<vmem>>, vector<1x32xf32>
    %11 = vector.broadcast %10 : vector<1x32xf32> to vector<8x32xf32>
    %12 = arith.addf %9, %11 : vector<8x32xf32>
    %cst_11 = arith.constant 0.000000e+00 : f32
    %13 = vector.broadcast %cst_11 : f32 to vector<8x32xf32>
    %14 = arith.maximumf %12, %13 : vector<8x32xf32>
    %c0_12 = arith.constant 0 : index
    %c0_13 = arith.constant 0 : index
    %15 = vector.load %arg6[%c0_12, %c0_13] : memref<1x32xf32, #tpu.memory_space<vmem>>, vector<1x32xf32>
    %16 = vector.broadcast %15 : vector<1x32xf32> to vector<8x32xf32>
    %17 = arith.mulf %14, %16 : vector<8x32xf32>
    %cst_14 = arith.constant dense<0.000000e+00> : vector<8xf32>
    %18 = vector.multi_reduction <add>, %17, %cst_14 [1] : vector<8x32xf32> to vector<8xf32>
    %c0_15 = arith.constant 0 : index
    %c0_16 = arith.constant 0 : index
    %19 = memref.load %arg7[%c0_15, %c0_16] : memref<1x1xf32, #tpu.memory_space<smem>>
    %20 = vector.broadcast %19 : f32 to vector<8xf32>
    %21 = arith.addf %18, %20 : vector<8xf32>
    %cst_17 = arith.constant 0.000000e+00 : f32
    %22 = vector.broadcast %cst_17 : f32 to vector<8xf32>
    %23 = arith.subf %22, %21 : vector<8xf32>
    %24 = math.exp %23 : vector<8xf32>
    %cst_18 = arith.constant 1.000000e+00 : f32
    %25 = vector.broadcast %cst_18 : f32 to vector<8xf32>
    %26 = arith.addf %25, %24 : vector<8xf32>
    %27 = tpu.reciprocal %26 : vector<8xf32> -> vector<8xf32>
    %28 = vector.shape_cast %27 : vector<8xf32> to vector<1x1x8xf32>
    %c0_19 = arith.constant 0 : index
    %c0_20 = arith.constant 0 : index
    %c0_21 = arith.constant 0 : index
    %29 = vector.load %arg8[%c0_19, %c0_20, %c0_21] : memref<1x1x8xf32, #tpu.memory_space<vmem>>, vector<1x1x8xf32>
    tpu.vector_store %arg8[%c0_19, %c0_20, %c0_21], %28 {strides = array<i32>} : memref<1x1x8xf32, #tpu.memory_space<vmem>>, vector<1x1x8xf32>,
    return
  }
  func.func @transform_0(%arg0: i32) -> (i32, i32) {
    %c0_i32 = arith.constant 0 : i32
    %c0_i32_0 = arith.constant 0 : i32
    return %arg0, %c0_i32 : i32, i32
  }
  func.func @transform_1(%arg0: i32) -> (i32, i32) {
    %c0_i32 = arith.constant 0 : i32
    %c0_i32_0 = arith.constant 0 : i32
    %c0_i32_1 = arith.constant 0 : i32
    return %c0_i32, %c0_i32_0 : i32, i32
  }
  func.func @transform_2(%arg0: i32) -> (i32, i32) {
    %c0_i32 = arith.constant 0 : i32
    %c0_i32_0 = arith.constant 0 : i32
    %c0_i32_1 = arith.constant 0 : i32
    return %c0_i32, %c0_i32_0 : i32, i32
  }
  func.func @transform_3(%arg0: i32) -> (i32, i32) {
    %c0_i32 = arith.constant 0 : i32
    %c0_i32_0 = arith.constant 0 : i32
    %c0_i32_1 = arith.constant 0 : i32
    return %c0_i32, %c0_i32_0 : i32, i32
  }
  func.func @transform_4(%arg0: i32) -> (i32, i32) {
    %c0_i32 = arith.constant 0 : i32
    %c0_i32_0 = arith.constant 0 : i32
    %c0_i32_1 = arith.constant 0 : i32
    return %c0_i32, %c0_i32_0 : i32, i32
  }
  func.func @transform_5(%arg0: i32) -> (i32, i32) {
    %c0_i32 = arith.constant 0 : i32
    %c0_i32_0 = arith.constant 0 : i32
    %c0_i32_1 = arith.constant 0 : i32
    return %c0_i32, %c0_i32_0 : i32, i32
  }
  func.func @transform_6(%arg0: i32) -> (i32, i32) {
    %c0_i32 = arith.constant 0 : i32
    %c0_i32_0 = arith.constant 0 : i32
    %c0_i32_1 = arith.constant 0 : i32
    return %c0_i32, %c0_i32_0 : i32, i32
  }
  func.func @transform_7(%arg0: i32) -> (i32, i32, i32) {
    %c0_i32 = arith.constant 0 : i32
    %c0_i32_0 = arith.constant 0 : i32
    %c0_i32_1 = arith.constant 0 : i32
    return %arg0, %c0_i32, %c0_i32_0 : i32, i32, i32
  }
}

</mosaic_0001>

<bundles_post_ra>
// kernel: tpu_custom_call.1
= control target key start
LH: loop header
LB: loop body
LE: loop exit
PB: predicated region body
PF: predicated region fallthrough
CT: control target
= control target key end

     0   :  { %13 = vsyncpa [#allocation4], 0  ;;  %s558_s0 = inlined_call_operand.hbm [shape: f32[8,32], index: 0, kind: input, shape index: {}]   ;;  %s559_s1 = inlined_call_operand.hbm [shape: f32[32,32], index: 1, kind: input, shape index: {}]   ;;  %s560_s2 = inlined_call_operand.vmem [shape: f32[1,32], index: 2, kind: input, shape index: {}]   ;;  %s561_s3 = inlined_call_operand.hbm [shape: f32[32,32], index: 3, kind: input, shape index: {}]   ;;  %s562_s4 = inlined_call_operand.vmem [shape: f32[1,32], index: 4, kind: input, shape index: {}]   ;;  %s563_s5 = inlined_call_operand.vmem [shape: f32[1,32], index: 5, kind: input, shape index: {}]   ;;  %s564_s6 = inlined_call_operand.<no memory space> [shape: f32[1,1], index: 6, kind: input, shape index: {}]   ;;  %s565_s7 = inlined_call_operand.hbm [shape: f32[1,1,8], index: 7, kind: output, shape index: {}]  }
   0x1   :  { %14 = vsyncpa [#allocation7], 0 }
   0x2   :  { %15 = vsyncpa [#allocation5], 0  ;;  %s440_s24 = smov [#allocation6]   ;;  %s346_s28 = scalar_lea.hbm %s559_s1, 512 }
   0x3   :  { %s31_s25 = sshll.u32 %s440_s24, 4  ;;  %p347_p0 = scmp.ne.s32.totalorder %s559_s1, %s346_s28  ;;  %s32_s25 = int_to_ptr.vmem [resolvable:$true] %s31_s25 }
   0x4   :  { %p350_p1 = scmp.lt.u32.totalorder %s346_s28, %s559_s1 }
   0x6   :  { %p352_p2 = pnand %p350_p1, %p347_p0 }
   0x8   :  { %355 = shalt.err (!%p352_p2)
}
   0x9   :  { %s356_s10 = scalar_lea.vmem %s32_s25, 512  ;;  %p361_p4 = scmp.lt.s32.totalorder %s32_s25, %s32_s25 }
   0xa   :  { %p357_p3 = scmp.ne.s32.totalorder %s32_s25, %s356_s10  ;;  %p362_p5 = scmp.lt.s32.totalorder %s356_s10, %s356_s10 }
   0xc   :  { %p363_p6 = por %p362_p5, %p361_p4 }
   0xe   :  { %p364_p7 = pnand %p363_p6, %p357_p3 }
  0x10   :  { %367 = shalt.err (!%p364_p7)
}
  0x11   :  { %s441_s11 = smov 128   ;;  %s442_s12 = smov 8  }
  0x12   :  { %37 = dma.hbm_to_vmem [thread:$0]  %s559_s1, 512, %s32_s25, [#allocation7], %s441_s11, %s441_s11, %s442_s12  }
  0x13   :  { %s443_s15 = smov [#allocation3]   ;;  %s444_s17 = smov [#allocation8]  }
  0x14   :  { %s22_s16 = sshll.u32 %s443_s15, 4  ;;  %s45_s18 = sshll.u32 %s444_s17, 4  ;;  %s23_s16 = int_to_ptr.vmem [resolvable:$true] %s22_s16  ;;  %s46_s18 = int_to_ptr.vmem [resolvable:$true] %s45_s18 }
  0x15   :  { %s368_s21 = scalar_lea.hbm %s558_s0, 128 }
  0x16   :  { %p369_p8 = scmp.ne.s32.totalorder %s558_s0, %s368_s21  ;;  %p372_p9 = scmp.lt.u32.totalorder %s368_s21, %s558_s0 }
  0x18   :  { %p374_p10 = pnand %p372_p9, %p369_p8 }
  0x1a   :  { %377 = shalt.err (!%p374_p10)
}
  0x1b   :  { %s378_s1 = scalar_lea.vmem %s23_s16, 128  ;;  %p383_p12 = scmp.lt.s32.totalorder %s23_s16, %s23_s16 }
  0x1c   :  { %p379_p11 = scmp.ne.s32.totalorder %s23_s16, %s378_s1  ;;  %p384_p13 = scmp.lt.s32.totalorder %s378_s1, %s378_s1 }
  0x1e   :  { %p385_p0 = por %p384_p13, %p383_p12 }
  0x20   :  { %p386_p1 = pnand %p385_p0, %p379_p11 }
  0x22   :  { %389 = shalt.err (!%p386_p1)
}
  0x23   :  { %25 = dma.hbm_to_vmem [thread:$0]  %s558_s0, 128, %s23_s16, [#allocation4]  }
  0x24   :  { %s390_s30 = scalar_lea.hbm %s561_s3, 512 }
  0x25   :  { %p391_p2 = scmp.ne.s32.totalorder %s561_s3, %s390_s30  ;;  %p394_p3 = scmp.lt.u32.totalorder %s390_s30, %s561_s3 }
  0x27   :  { %p396_p4 = pnand %p394_p3, %p391_p2 }
  0x29   :  { %399 = shalt.err (!%p396_p4)
}
  0x2a   :  { %s400_s14 = scalar_lea.vmem %s46_s18, 512  ;;  %p405_p6 = scmp.lt.s32.totalorder %s46_s18, %s46_s18 }
  0x2b   :  { %p401_p5 = scmp.ne.s32.totalorder %s46_s18, %s400_s14  ;;  %p406_p7 = scmp.lt.s32.totalorder %s400_s14, %s400_s14 }
  0x2d   :  { %p407_p8 = por %p406_p7, %p405_p6 }
  0x2f   :  { %p408_p9 = pnand %p407_p8, %p401_p5 }
  0x31   :  { %411 = shalt.err (!%p408_p9)
}
  0x32   :  { %51 = dma.hbm_to_vmem [thread:$0]  %s561_s3, 512, %s46_s18, [#allocation7], %s441_s11, %s441_s11, %s442_s12  }
  0x33   :  { %434 = dma.done.wait [#allocation4], 128  }
  0x34   :  { %435 = vsyncadd [#allocation4], 4294967168 }
  0x35   :  { %436 = dma.done.wait [#allocation7], 1024  }
  0x36   :  { %437 = vsyncadd [#allocation7], 4294966272  ;;  %v445_v0 = vmov 0.0|0.0   ;;  %vm446_vm0 = vmmov 0   ;;  %v447_v1 = vmov 0.0   ;;  %v68_v2 = vld [vmem:[#allocation6] sm:$0xff]  ;;  %v251_v28 = vstv %s564_s6 }
  0x37   :  { %321 = vmatprep.subr.bf16.mxu0 %v445_v0  ;;  %307 = vmatprep.mubr.msk.f32.mxu0 %vm446_vm0, %v447_v1  ;;  %v69_v3 = vld [vmem:[#allocation6 + $0x8] sm:$0xff]  ;;  %v70_v4 = vld [vmem:[#allocation6 + $0x10] sm:$0xff]  ;;  %v71_v6 = vld [vmem:[#allocation6 + $0x18] sm:$0xff]  ;;  %vm79_vm1 = vcmask 261120   ;;  %v259_v35 = vlaneseq  ;;  %vm266_vm2 = vcmask 57344  }
  0x38   :  { %327 = vmatprep.subr.bf16.mxu1 %v445_v0  ;;  %318 = vmatprep.mubr.msk.f32.mxu1 %vm446_vm0, %v447_v1  ;;  %v322_v5 = vpack.c.bf16 %v69_v3, %v68_v2  ;;  %v154_v7 = vld [vmem:[#allocation8] sm:$0xff]  ;;  %v155_v8 = vld [vmem:[#allocation8 + $0x8] sm:$0xff]  ;;  %v325_v9 = vpack.c.bf16 %v71_v6, %v70_v4  ;;  %v67_v11 = vld [vmem:[#allocation3] sm:$0xff] }
  0x39   :  { %v328_v10 = vpack.c.bf16 %v155_v8, %v154_v7  ;;  %v156_v12 = vld [vmem:[#allocation8 + $0x10] sm:$0xff]  ;;  %v157_v13 = vld [vmem:[#allocation8 + $0x18] sm:$0xff]  ;;  %v260_v36 = vand.u32 127, %v259_v35  ;;  %v262_v37 = vshrl.u32 %v259_v35, 7 }
  0x3a   :  { %323 = vmatpush3.bf16.msra.mxu0 %v322_v5  ;;  %v331_v14 = vpack.c.bf16 %v157_v13, %v156_v12  ;;  %v284_v15 = vld [vmem:[%s560_s2] ss:$0 sm:$0xff] }
  0x3b   :  { %324 = vmatprep.subr.bf16.mxu0 %v445_v0  ;;  %329 = vmatpush3.bf16.msra.mxu1 %v328_v10  ;;  %v286_v20 = vld [vmem:[%s562_s4] ss:$0 sm:$0xff]  ;;  %v263_v38 = vsub.s32 %v260_v36, %v262_v37  ;;  %s448_s4 = smov [#allocation9]  }
  0x3c   :  { %330 = vmatprep.subr.bf16.mxu1 %v445_v0  ;;  %v288_v24 = vld [vmem:[%s563_s5] ss:$0 sm:$0xff]  ;;  %s274_s5 = sshll.u32 %s448_s4, 4  ;;  %s275_s5 = int_to_ptr.vmem [resolvable:$true] %s274_s5 }
  0x3d   :  { %s412_s6 = scalar_lea.vmem %s275_s5, 16  ;;  %s416_s20 = scalar_lea.vmem %s275_s5, 32 }
  0x3e   :  { %326 = vmatpush3.bf16.msra.mxu0 %v325_v9  ;;  %p413_p10 = scmp.ne.s32.totalorder %s275_s5, %s412_s6  ;;  %p417_p11 = scmp.lt.s32.totalorder %s275_s5, %s275_s5 }
  0x3f   :  { %332 = vmatpush3.bf16.msra.mxu1 %v331_v14  ;;  %p418_p12 = scmp.lt.s32.totalorder %s416_s20, %s412_s6 }
  0x41   :  { %308 = vmatmul.mubr.msk.f32.vlgmr.msra.gmra.mrb[0].mxu0 %vm79_vm1, %v67_v11  ;;  %p419_p13 = por %p418_p12, %p417_p11 }
  0x43   :  { %p420_p0 = pnand %p419_p13, %p413_p10 }
 0x114   :  { %v149_v16 = vpop.f32.mrb[0].mxu0 }
 0x115   :  { %v150_v17 = vadd.f32 %v284_v15, %v149_v16  ;;  %v309_v18 = vpop.f32.mrb[1].mxu0 }
 0x117   :  { %v153_v19 = vmax.f32 %v150_v17, 0.0 }
 0x119   :  { %319 = vmatmul.mubr.msk.f32.vlgmr.msra.gmra.mrb[0].mxu1 %vm79_vm1, %v153_v19 }
 0x1ec   :  { %v234_v21 = vpop.f32.mrb[0].mxu1 }
 0x1ed   :  { %v235_v22 = vadd.f32 %v286_v20, %v234_v21  ;;  %v320_v23 = vpop.f32.mrb[1].mxu1 }
 0x1ef   :  { %v238_v25 = vmax.f32 %v235_v22, 0.0 }
 0x1f1   :  { %v246_v26 = vmul.f32 %v288_v24, %v238_v25 }
 0x1f3   :  { %v247_v27 = vsel %vm79_vm1, %v246_v26, 0.0 }
 0x1f4   :  { %248 = vadd.xlane.f32.xlu0 %v247_v27 }
 0x281   :  { %v249_v29 = vpop.xlane.xlu0 %248 }
 0x282   :  { %v252_v30 = vadd.f32 %v251_v28, %v249_v29 }
 0x284   :  { %v253_v31 = vsub.f32 0.0, %v252_v30 }
 0x286   :  { %v254_v32 = vmul.f32 1.442695, %v253_v31 }
 0x288   :  { %342 = vpow2.f32 %v254_v32 }
 0x292   :  { %v343_v33 = vpop.eup %342 }
 0x293   :  { %v256_v34 = vadd.f32 1.0, %v343_v33 }
 0x295   :  { %344 = vrcp.f32 %v256_v34 }
 0x29f   :  { %v345_v39 = vpop.eup %344 }
 0x2a0   :  { %v264_v40 = vrot.slane %v345_v39, %v263_v38 }
 0x2a2   :  { %267 = vst.msk [vmem:[#allocation9] sm:$0x1] %vm266_vm2, %v264_v40 }
 0x2a3   :  { %423 = shalt.err (!%p420_p0)
}
 0x2a4   :  { %s424_s23 = scalar_lea.hbm %s565_s7, 16 }
 0x2a5   :  { %p425_p1 = scmp.ne.s32.totalorder %s565_s7, %s424_s23  ;;  %p428_p2 = scmp.lt.u32.totalorder %s424_s23, %s565_s7 }
 0x2a7   :  { %p430_p3 = pnand %p428_p2, %p425_p1 }
 0x2a9   :  { %433 = shalt.err (!%p430_p3)
}
 0x2aa   :  { %277 = dma.vmem_to_hbm [thread:$0]  %s275_s5, 16, %s565_s7, [#allocation5]  }
 0x2ab   :  { %438 = dma.done.wait [#allocation5], 16  }
 0x2ac   :  { %439 = vsyncadd [#allocation5], 4294967280 }
 0x2ad   :  { %281 = vsyncpa [#allocation4], 1 }
 0x2ae   :  { %282 = vsyncpa [#allocation7], 1 }
 0x2af   :  { %283 = vsyncpa [#allocation5], 1 }

</bundles_post_ra>
